<compile_context>
chip_gen: v7x
topology: tpu7x:2x2x1
jax: 0.10.0
libtpu: 0.0.40
codegen_flags: <defaults>
</compile_context>

<pallas_src>
import jax
import jax.numpy as jnp
from jax.experimental import pallas as pl
from jax.experimental.pallas import tpu as pltpu


def _round_up(x, m):
    return ((x + m - 1) // m) * m


def make_value_kernel(n_hidden):
    """Kernel refs (in order): x (tb, in_dim); then (w_l, b_l) per hidden layer
    (VMEM-resident); then head wv (h_last, 1), bv (1, 1); then out (1, tb)."""

    def kernel(*refs):
        x_ref = refs[0]
        layer_refs = refs[1:1 + 2 * n_hidden]
        wv_ref = refs[1 + 2 * n_hidden]
        bv_ref = refs[2 + 2 * n_hidden]
        o_ref = refs[3 + 2 * n_hidden]

        # Batch-major block (tb, in_dim) -> feature-major (in_dim, tb):
        # batch lives on lanes, features on sublanes.  XLU transpose overlaps
        # MXU / DMA and replaces a full wrapper-side HBM transpose pass.
        h = x_ref[...].T

        for l in range(n_hidden):
            w = layer_refs[2 * l][...]          # (d_out, d_in)
            b = layer_refs[2 * l + 1][...]      # (d_out, 1) -> lane broadcast
            h = jnp.dot(w, h, preferred_element_type=jnp.float32) + b
            h = jnp.maximum(h, 0.0)

        # N=1 value head: VPU multiply + sublane reduce (XLU slot), not an
        # MXU pass with 99% padding.  Result is a lane-dense (1, tb) row.
        wv = wv_ref[...]                         # (h_last, 1)
        bv = bv_ref[...]                         # (1, 1)
        v = jnp.sum(h * wv, axis=0, keepdims=True) + bv
        o_ref[...] = v.astype(o_ref.dtype)

    return kernel


def value_network_forward(state, params, tb_max=4096):
    """Fused Pallas forward for the SAC ValueNetwork.

    state  : (batch, in_features) float32, batch-major (consumed as-is; no
             wrapper transpose or pad).
    params : list of (weight, bias) pairs in PyTorch nn.Linear layout, hidden
             layers first, value head last:
               weight_l (out_l, in_l), bias_l (out_l,)
               wv (1, h_last), bv (1,)
    returns: (batch, 1) float32
    """
    *hidden, (wv, bv) = params
    batch, in_dim = state.shape

    # Batch tile selection:
    #  * batch <= 128: one full-array block (no masking at all).
    #  * otherwise: as large as tb_max (per-step VMEM is only ~1-2 MiB even
    #    at tb=8192), multiple of 128 (lane-dense output stores), and capped
    #    at round_up(cdiv(batch, 2), 128) so the "parallel" grid keeps >= 2
    #    steps for v7x's two TensorCores.
    if batch <= 128:
        tb = batch
    else:
        tb = min(int(tb_max), _round_up(pl.cdiv(batch, 2), 128))
        tb = max(128, _round_up(tb, 128))
    grid = (pl.cdiv(batch, tb),)   # partial last block handled by Pallas masking

    # Separate VMEM-resident refs for each weight / bias (no [W|b] concat, no
    # per-step in-kernel slicing).  Biases as (out, 1) columns broadcast over
    # lanes in feature-major compute; head as (h_last, 1) + (1, 1).
    layer_args = []
    for w, b in hidden:
        layer_args += [w, b.reshape(-1, 1)]
    wv_col = wv.reshape(-1, 1)
    bv_col = bv.reshape(1, 1)

    kernel = make_value_kernel(len(hidden))
    resident = lambda a: pl.BlockSpec(a.shape, lambda i: (0, 0))

    out = pl.pallas_call(
        kernel,
        out_shape=jax.ShapeDtypeStruct((1, batch), jnp.float32),
        grid=grid,
        in_specs=[pl.BlockSpec((tb, in_dim), lambda i: (i, 0))]   # 1 contiguous DMA/step
                 + [resident(a) for a in layer_args]
                 + [resident(wv_col), resident(bv_col)],
        out_specs=pl.BlockSpec((1, tb), lambda i: (0, i)),        # lane-dense row
        compiler_params=pltpu.CompilerParams(
            dimension_semantics=("parallel",),   # shards steps across v7x's 2 TCs
            vmem_limit_bytes=32 * 1024 * 1024,
        ),
    )(state, *layer_args, wv_col, bv_col)

    return out.reshape(batch, 1)


def init_params(key, input_dim, fc_dims):
    """nn.Linear-style init: U(-1/sqrt(fan_in), 1/sqrt(fan_in)), PyTorch layout."""
    dims = [input_dim] + list(fc_dims)
    keys = jax.random.split(key, len(fc_dims) + 1)
    params = []
    for i in range(len(fc_dims)):
        fan_in, fan_out = dims[i], dims[i + 1]
        bound = 1.0 / (fan_in ** 0.5)
        kw, kb = jax.random.split(keys[i])
        w = jax.random.uniform(kw, (fan_out, fan_in), jnp.float32, -bound, bound)
        b = jax.random.uniform(kb, (fan_out,), jnp.float32, -bound, bound)
        params.append((w, b))
    fan_in = dims[-1]
    bound = 1.0 / (fan_in ** 0.5)
    kw, kb = jax.random.split(keys[-1])
    wv = jax.random.uniform(kw, (1, fan_in), jnp.float32, -bound, bound)
    bv = jax.random.uniform(kb, (1,), jnp.float32, -bound, bound)
    params.append((wv, bv))
    return params


def reference_forward(state, params):
    *hidden, (wv, bv) = params
    h = state
    for w, b in hidden:
        h = jnp.maximum(h @ w.T + b, 0.0)
    return h @ wv.T + bv


if __name__ == "__main__":
    key = jax.random.PRNGKey(0)
    k_state, k_params = jax.random.split(key)

    batch = 8
    input_dims = (8,)          # *input_dims -> fc1 in_features
    fc_dims = [32, 32]         # hidden layer widths

    state = jax.random.normal(k_state, (batch, input_dims[0]), dtype=jnp.float32)
    params = init_params(k_params, input_dims[0], fc_dims)

    # Tiny-batch path: single full-array block (tb = batch).
    v = jax.block_until_ready(value_network_forward(state, params))
    v_ref = reference_forward(state, params)
    assert v.shape == (batch, 1)
    assert jnp.allclose(v, v_ref, atol=1e-5, rtol=1e-5), \
        f"max abs err {float(jnp.max(jnp.abs(v - v_ref)))}"

    # Multi-step grid with a partial trailing block (no wrapper pad/transpose).
    batch2 = 300
    state2 = jax.random.normal(k_state, (batch2, input_dims[0]), dtype=jnp.float32)
    v2 = jax.block_until_ready(value_network_forward(state2, params))
    v2_ref = reference_forward(state2, params)
    assert v2.shape == (batch2, 1)
    assert jnp.allclose(v2, v2_ref, atol=1e-5, rtol=1e-5), \
        f"max abs err {float(jnp.max(jnp.abs(v2 - v2_ref)))}"

    # Several grid steps with a capped tile (exercises >=2-step pipelining).
    batch3 = 1000
    state3 = jax.random.normal(k_state, (batch3, input_dims[0]), dtype=jnp.float32)
    v3 = jax.block_until_ready(value_network_forward(state3, params, tb_max=256))
    v3_ref = reference_forward(state3, params)
    assert v3.shape == (batch3, 1)
    assert jnp.allclose(v3, v3_ref, atol=1e-5, rtol=1e-5), \
        f"max abs err {float(jnp.max(jnp.abs(v3 - v3_ref)))}"

    print("KERNEL_OK")
</pallas_src>

<mosaic_0001>
module attributes {stable_mosaic.version = 11 : i64} {
  func.func @kernel(%arg0: i32, %arg1: memref<8x8xf32, #tpu.memory_space<vmem>>, %arg2: memref<32x8xf32, #tpu.memory_space<vmem>>, %arg3: memref<32x1xf32, #tpu.memory_space<vmem>>, %arg4: memref<32x32xf32, #tpu.memory_space<vmem>>, %arg5: memref<32x1xf32, #tpu.memory_space<vmem>>, %arg6: memref<32x1xf32, #tpu.memory_space<vmem>>, %arg7: memref<1x1xf32, #tpu.memory_space<vmem>>, %arg8: memref<1x8xf32, #tpu.memory_space<vmem>>) attributes {dimension_semantics = [#tpu.dimension_semantics<parallel>], iteration_bounds = array<i64: 1>, scalar_prefetch = 0 : i64, scratch_operands = 0 : i64, tpu.core_type = #tpu.core_type<tc>, window_params = [{transform_indices = @transform_0, window_bounds = array<i64: 8, 8>}, {pipeline_mode = #tpu.pipeline_mode<synchronous>, transform_indices = @transform_1, window_bounds = array<i64: 32, 8>}, {pipeline_mode = #tpu.pipeline_mode<synchronous>, transform_indices = @transform_2, window_bounds = array<i64: 32, 1>}, {pipeline_mode = #tpu.pipeline_mode<synchronous>, transform_indices = @transform_3, window_bounds = array<i64: 32, 32>}, {pipeline_mode = #tpu.pipeline_mode<synchronous>, transform_indices = @transform_4, window_bounds = array<i64: 32, 1>}, {pipeline_mode = #tpu.pipeline_mode<synchronous>, transform_indices = @transform_5, window_bounds = array<i64: 32, 1>}, {pipeline_mode = #tpu.pipeline_mode<synchronous>, transform_indices = @transform_6, window_bounds = array<i64: 1, 1>}, {transform_indices = @transform_7, window_bounds = array<i64: 1, 8>}]} {
    %c0 = arith.constant 0 : index
    %c0_0 = arith.constant 0 : index
    %0 = vector.load %arg1[%c0, %c0_0] : memref<8x8xf32, #tpu.memory_space<vmem>>, vector<8x8xf32>
    %1 = tpu.transpose %0, [1, 0] : vector<8x8xf32> -> vector<8x8xf32>
    %c0_1 = arith.constant 0 : index
    %c0_2 = arith.constant 0 : index
    %2 = vector.load %arg2[%c0_1, %c0_2] : memref<32x8xf32, #tpu.memory_space<vmem>>, vector<32x8xf32>
    %c0_3 = arith.constant 0 : index
    %c0_4 = arith.constant 0 : index
    %3 = vector.load %arg3[%c0_3, %c0_4] : memref<32x1xf32, #tpu.memory_space<vmem>>, vector<32x1xf32>
    %cst = arith.constant dense<0.000000e+00> : vector<32x8xf32>
    %4 = tpu.matmul %2, %1, %cst {dimension_numbers = #tpu.dot_dimension_numbers<[1], [0], [0], [1], [0, 0, 1, 1], [], []>} : vector<32x8xf32>, vector<8x8xf32>, vector<32x8xf32> -> vector<32x8xf32>
    %5 = vector.broadcast %3 : vector<32x1xf32> to vector<32x8xf32>
    %6 = arith.addf %4, %5 : vector<32x8xf32>
    %cst_5 = arith.constant 0.000000e+00 : f32
    %7 = vector.broadcast %cst_5 : f32 to vector<32x8xf32>
    %8 = arith.maximumf %6, %7 : vector<32x8xf32>
    %c0_6 = arith.constant 0 : index
    %c0_7 = arith.constant 0 : index
    %9 = vector.load %arg4[%c0_6, %c0_7] : memref<32x32xf32, #tpu.memory_space<vmem>>, vector<32x32xf32>
    %c0_8 = arith.constant 0 : index
    %c0_9 = arith.constant 0 : index
    %10 = vector.load %arg5[%c0_8, %c0_9] : memref<32x1xf32, #tpu.memory_space<vmem>>, vector<32x1xf32>
    %cst_10 = arith.constant dense<0.000000e+00> : vector<32x8xf32>
    %11 = tpu.matmul %9, %8, %cst_10 {dimension_numbers = #tpu.dot_dimension_numbers<[1], [0], [0], [1], [0, 0, 1, 1], [], []>} : vector<32x32xf32>, vector<32x8xf32>, vector<32x8xf32> -> vector<32x8xf32>
    %12 = vector.broadcast %10 : vector<32x1xf32> to vector<32x8xf32>
    %13 = arith.addf %11, %12 : vector<32x8xf32>
    %cst_11 = arith.constant 0.000000e+00 : f32
    %14 = vector.broadcast %cst_11 : f32 to vector<32x8xf32>
    %15 = arith.maximumf %13, %14 : vector<32x8xf32>
    %c0_12 = arith.constant 0 : index
    %c0_13 = arith.constant 0 : index
    %16 = vector.load %arg6[%c0_12, %c0_13] : memref<32x1xf32, #tpu.memory_space<vmem>>, vector<32x1xf32>
    %c0_14 = arith.constant 0 : index
    %c0_15 = arith.constant 0 : index
    %17 = vector.load %arg7[%c0_14, %c0_15] : memref<1x1xf32, #tpu.memory_space<vmem>>, vector<1x1xf32>
    %18 = vector.broadcast %16 : vector<32x1xf32> to vector<32x8xf32>
    %19 = arith.mulf %15, %18 : vector<32x8xf32>
    %cst_16 = arith.constant dense<0.000000e+00> : vector<8xf32>
    %20 = vector.multi_reduction <add>, %19, %cst_16 [0] : vector<32x8xf32> to vector<8xf32>
    %21 = vector.shape_cast %20 : vector<8xf32> to vector<1x8xf32>
    %22 = vector.broadcast %17 : vector<1x1xf32> to vector<1x8xf32>
    %23 = arith.addf %21, %22 : vector<1x8xf32>
    %c0_17 = arith.constant 0 : index
    %c0_18 = arith.constant 0 : index
    %24 = vector.load %arg8[%c0_17, %c0_18] : memref<1x8xf32, #tpu.memory_space<vmem>>, vector<1x8xf32>
    tpu.vector_store %arg8[%c0_17, %c0_18], %23 {strides = array<i32>} : memref<1x8xf32, #tpu.memory_space<vmem>>, vector<1x8xf32>,
    return
  }
  func.func @transform_0(%arg0: i32) -> (i32, i32) {
    %c0_i32 = arith.constant 0 : i32
    %c0_i32_0 = arith.constant 0 : i32
    return %arg0, %c0_i32 : i32, i32
  }
  func.func @transform_1(%arg0: i32) -> (i32, i32) {
    %c0_i32 = arith.constant 0 : i32
    %c0_i32_0 = arith.constant 0 : i32
    %c0_i32_1 = arith.constant 0 : i32
    return %c0_i32, %c0_i32_0 : i32, i32
  }
  func.func @transform_2(%arg0: i32) -> (i32, i32) {
    %c0_i32 = arith.constant 0 : i32
    %c0_i32_0 = arith.constant 0 : i32
    %c0_i32_1 = arith.constant 0 : i32
    return %c0_i32, %c0_i32_0 : i32, i32
  }
  func.func @transform_3(%arg0: i32) -> (i32, i32) {
    %c0_i32 = arith.constant 0 : i32
    %c0_i32_0 = arith.constant 0 : i32
    %c0_i32_1 = arith.constant 0 : i32
    return %c0_i32, %c0_i32_0 : i32, i32
  }
  func.func @transform_4(%arg0: i32) -> (i32, i32) {
    %c0_i32 = arith.constant 0 : i32
    %c0_i32_0 = arith.constant 0 : i32
    %c0_i32_1 = arith.constant 0 : i32
    return %c0_i32, %c0_i32_0 : i32, i32
  }
  func.func @transform_5(%arg0: i32) -> (i32, i32) {
    %c0_i32 = arith.constant 0 : i32
    %c0_i32_0 = arith.constant 0 : i32
    %c0_i32_1 = arith.constant 0 : i32
    return %c0_i32, %c0_i32_0 : i32, i32
  }
  func.func @transform_6(%arg0: i32) -> (i32, i32) {
    %c0_i32 = arith.constant 0 : i32
    %c0_i32_0 = arith.constant 0 : i32
    %c0_i32_1 = arith.constant 0 : i32
    return %c0_i32, %c0_i32_0 : i32, i32
  }
  func.func @transform_7(%arg0: i32) -> (i32, i32) {
    %c0_i32 = arith.constant 0 : i32
    %c0_i32_0 = arith.constant 0 : i32
    return %c0_i32, %arg0 : i32, i32
  }
}

</mosaic_0001>

<bundles_post_ra>
// kernel: tpu_custom_call.1
= control target key start
LH: loop header
LB: loop body
LE: loop exit
PB: predicated region body
PF: predicated region fallthrough
CT: control target
= control target key end

     0   :  { %s575_s0 = inlined_call_operand.vmem [shape: f32[8,8], index: 0, kind: input, shape index: {}]   ;;  %s576_s1 = inlined_call_operand.vmem [shape: f32[32,8], index: 1, kind: input, shape index: {}]   ;;  %s577_s2 = inlined_call_operand.vmem [shape: f32[32,1], index: 2, kind: input, shape index: {}]   ;;  %s578_s3 = inlined_call_operand.vmem [shape: f32[32,32], index: 3, kind: input, shape index: {}]   ;;  %s579_s4 = inlined_call_operand.vmem [shape: f32[32,1], index: 4, kind: input, shape index: {}]   ;;  %s580_s5 = inlined_call_operand.vmem [shape: f32[32,1], index: 5, kind: input, shape index: {}]   ;;  %s581_s6 = inlined_call_operand.<no memory space> [shape: f32[1,1], index: 6, kind: input, shape index: {}]   ;;  %s582_s7 = inlined_call_operand.hbm [shape: f32[1,8], index: 7, kind: output, shape index: {}]  }
   0x1   :  { %v12_v0 = vstv %s581_s6 }
   0x2   :  { %13 = vst [vmem:[#allocation2] sm:$0x1] %v12_v0 }
   0x3   :  { %v29_v1 = vld [vmem:[%s575_s0] sm:$0xff]  ;;  %vm58_vm0 = vcmask 64512   ;;  %v31_v4 = vld [vmem:[%s576_s1 + $0x8] sm:$0xff]  ;;  %v441_v5 = vmov 0   ;;  %v36_v6 = vld [vmem:[%s577_s2 + $0x10] sm:$0xff] }
   0x4   :  { %v30_v2 = vld [vmem:[%s576_s1] sm:$0xff]  ;;  %383 = vmatprep.subr.msk.mxu0 %vm58_vm0, %v29_v1  ;;  %415 = vset.pattern.permute.xlu0 %v441_v5  ;;  %v32_v7 = vld [vmem:[%s576_s1 + $0x10] sm:$0xff]  ;;  %v35_v8 = vld [vmem:[%s577_s2 + $0x8] sm:$0xff] }
   0x5   :  { %385 = vmatprep.mubr.msk.f32.mxu0 %vm58_vm0, %v30_v2  ;;  %v34_v3 = vld [vmem:[%s577_s2] sm:$0xff]  ;;  %384 = vmatpush3.xpose.msk.msra.mxu0 %vm58_vm0, %v29_v1  ;;  %v37_v9 = vld [vmem:[%s577_s2 + $0x18] sm:$0xff] }
   0x6   :  { %40 = vperm.xlu0 %415, %v34_v3   ;;  %416 = vset.pattern.permute.xlu1 %v441_v5  ;;  %v33_v10 = vld [vmem:[%s576_s1 + $0x18] sm:$0xff] }
   0x7   :  { %50 = vperm.xlu1 %416, %v36_v6  }
   0x8   :  { %386 = vmatmul.mubr.msk.f32.vlgmr.msra.gmra.mrb[0].mxu0 %vm58_vm0, %v31_v4 }
   0x9   :  { %388 = vmatprep.mubr.msk.f32.mxu0 %vm58_vm0, %v32_v7 }
   0xa   :  { %14 = vsyncpa [#allocation4], 0  ;;  %45 = vperm.xlu0 %415, %v35_v8   ;;  %v167_v11 = vld [vmem:[%s579_s4] sm:$0xff]  ;;  %v168_v12 = vld [vmem:[%s579_s4 + $0x8] sm:$0xff]  ;;  %vm191_vm1 = vcmask 261120   ;;  %v340_v8 = vlaneseq  ;;  %vm345_vm2 = vcmask 57344  }
   0xb   :  { %55 = vperm.xlu1 %416, %v37_v9   ;;  %v169_v13 = vld [vmem:[%s579_s4 + $0x10] sm:$0xff]  ;;  %v170_v14 = vld [vmem:[%s579_s4 + $0x18] sm:$0xff]  ;;  %v293_v15 = vld [vmem:[%s580_s5] sm:$0xff] }
   0xc   :  { %389 = vmatmul.mubr.msk.f32.gmra.mrb[2].mxu0 %vm58_vm0, %v33_v10  ;;  %v294_v16 = vld [vmem:[%s580_s5 + $0x8] sm:$0xff]  ;;  %v295_v17 = vld [vmem:[%s580_s5 + $0x10] sm:$0xff]  ;;  %v296_v18 = vld [vmem:[%s580_s5 + $0x18] sm:$0xff] }
   0xd   :  { %v297_v19 = vld [vmem:[#allocation2] sm:$0x1]  ;;  %v164_v39 = vld [vmem:[%s578_s3 + $0x8] sm:$0xff]  ;;  %v165_v40 = vld [vmem:[%s578_s3 + $0x10] sm:$0xff] }
   0xe   :  { %173 = vperm.xlu0 %415, %v167_v11   ;;  %v163_v20 = vld [vmem:[%s578_s3] sm:$0xff]  ;;  %v166_v41 = vld [vmem:[%s578_s3 + $0x18] sm:$0xff]  ;;  %v341_v11 = vshrl.u32 %v340_v8, 7  ;;  %s442_s3 = smov [#allocation3]  }
   0xf   :  { %178 = vperm.xlu1 %416, %v168_v12   ;;  %399 = vmatprep.mubr.msk.f32.mxu1 %vm191_vm1, %v163_v20  ;;  %s353_s14 = sshll.u32 %s442_s3, 4  ;;  %s354_s14 = int_to_ptr.vmem [resolvable:$true] %s353_s14 }
  0x10   :  { %s417_s15 = scalar_lea.vmem %s354_s14, 16  ;;  %s421_s16 = scalar_lea.vmem %s354_s14, 32 }
  0x11   :  { %p418_p0 = scmp.ne.s32.totalorder %s354_s14, %s417_s15  ;;  %p422_p1 = scmp.lt.s32.totalorder %s354_s14, %s354_s14 }
  0x12   :  { %183 = vperm.xlu0 %415, %v169_v13   ;;  %p423_p2 = scmp.lt.s32.totalorder %s421_s16, %s417_s15 }
  0x13   :  { %188 = vperm.xlu1 %416, %v170_v14   ;;  %v342_v14 = vsub.s32 0, %v341_v11 }
  0x14   :  { %p424_p3 = por %p423_p2, %p422_p1 }
  0x16   :  { %300 = vperm.xlu0 %415, %v293_v15   ;;  %p425_p4 = pnand %p424_p3, %p418_p0 }
  0x17   :  { %305 = vperm.xlu1 %416, %v294_v16  }
  0x1a   :  { %310 = vperm.xlu0 %415, %v295_v17  }
  0x1b   :  { %315 = vperm.xlu1 %416, %v296_v18  }
  0x1e   :  { %337 = vperm.xlu0 %415, %v297_v19  }
  0x85   :  { %v41_v21 = vpop.permute.xlu0 %40 }
  0x86   :  { %v51_v22 = vpop.permute.xlu1 %50 }
  0x89   :  { %v46_v23 = vpop.permute.xlu0 %45 }
  0x8a   :  { %v56_v29 = vpop.permute.xlu1 %55 }
  0x8d   :  { %v174_v42 = vpop.permute.xlu0 %173 }
  0x8e   :  { %v179_v43 = vpop.permute.xlu1 %178 }
  0x91   :  { %v184_v44 = vpop.permute.xlu0 %183 }
  0x92   :  { %v189_v45 = vpop.permute.xlu1 %188 }
  0x95   :  { %v301_v50 = vpop.permute.xlu0 %300 }
  0x96   :  { %v306_v51 = vpop.permute.xlu1 %305 }
  0x99   :  { %v311_v0 = vpop.permute.xlu0 %310 }
  0x9a   :  { %v316_v1 = vpop.permute.xlu1 %315 }
  0x9d   :  { %v338_v16 = vpop.permute.xlu0 %337 }
  0x9e   :  { %v343_v18 = vrot.slane %v338_v16, %v342_v14 }
  0xdb   :  { %v387_v24 = vpop.f32.mrb[0].mxu0 }
  0xdc   :  { %v146_v25 = vadd.f32 %v387_v24, %v46_v23  ;;  %v140_v26 = vpop.f32.mrb[1].mxu0 }
  0xdd   :  { %v141_v27 = vadd.f32 %v140_v26, %v41_v21 }
  0xde   :  { %v160_v28 = vmax.f32 %v146_v25, 0.0 }
  0xdf   :  { %v159_v30 = vmax.f32 %v141_v27, 0.0  ;;  %v390_v31 = vpop.f32.mrb[2].mxu0 }
  0xe0   :  { %v156_v32 = vadd.f32 %v390_v31, %v56_v29  ;;  %v150_v33 = vpop.f32.mrb[3].mxu0 }
  0xe1   :  { %v151_v34 = vadd.f32 %v150_v33, %v51_v22  ;;  %v405_v35 = vpack.c.bf16 %v160_v28, %v159_v30 }
  0xe2   :  { %v162_v36 = vmax.f32 %v156_v32, 0.0 }
  0xe3   :  { %v161_v37 = vmax.f32 %v151_v34, 0.0  ;;  %406 = vmatprep.subr.bf16.mxu1 %v405_v35 }
  0xe4   :  { %408 = vmatpush3.bf16.msra.mxu1 %v405_v35 }
  0xe5   :  { %v409_v38 = vpack.c.bf16 %v162_v36, %v161_v37 }
  0xe7   :  { %410 = vmatprep.subr.bf16.mxu1 %v409_v38 }
  0xe8   :  { %412 = vmatpush3.bf16.msra.mxu1 %v409_v38 }
  0xeb   :  { %400 = vmatmul.mubr.msk.f32.vlgmr.msra.gmra.mrb[0].mxu1 %vm191_vm1, %v164_v39 }
  0xec   :  { %402 = vmatprep.mubr.msk.f32.mxu1 %vm191_vm1, %v165_v40 }
  0xef   :  { %403 = vmatmul.mubr.msk.f32.gmra.mrb[2].mxu1 %vm191_vm1, %v166_v41 }
 0x1be   :  { %v401_v46 = vpop.f32.mrb[0].mxu1 }
 0x1bf   :  { %v276_v47 = vadd.f32 %v401_v46, %v179_v43  ;;  %v270_v48 = vpop.f32.mrb[1].mxu1 }
 0x1c0   :  { %v271_v49 = vadd.f32 %v270_v48, %v174_v42 }
 0x1c1   :  { %v290_v52 = vmax.f32 %v276_v47, 0.0 }
 0x1c2   :  { %v289_v53 = vmax.f32 %v271_v49, 0.0  ;;  %v404_v54 = vpop.f32.mrb[2].mxu1 }
 0x1c3   :  { %v319_v55 = vmul.f32 %v306_v51, %v290_v52  ;;  %v286_v56 = vadd.f32 %v404_v54, %v189_v45  ;;  %v280_v57 = vpop.f32.mrb[3].mxu1 }
 0x1c4   :  { %v318_v58 = vmul.f32 %v301_v50, %v289_v53  ;;  %v281_v59 = vadd.f32 %v280_v57, %v184_v44 }
 0x1c5   :  { %v323_v60 = vsel %vm58_vm0, %v319_v55, 0.0  ;;  %v292_v61 = vmax.f32 %v286_v56, 0.0 }
 0x1c6   :  { %v322_v62 = vsel %vm58_vm0, %v318_v58, 0.0  ;;  %v291_v63 = vmax.f32 %v281_v59, 0.0 }
 0x1c7   :  { %v324_v2 = vadd.f32 %v323_v60, %v322_v62  ;;  %v321_v3 = vmul.f32 %v316_v1, %v292_v61 }
 0x1c8   :  { %v320_v4 = vmul.f32 %v311_v0, %v291_v63 }
 0x1c9   :  { %v327_v7 = vsel %vm58_vm0, %v321_v3, 0.0 }
 0x1ca   :  { %v325_v5 = vsel %vm58_vm0, %v320_v4, 0.0 }
 0x1cb   :  { %v326_v6 = vadd.f32 %v325_v5, %v324_v2 }
 0x1cd   :  { %v328_v9 = vadd.f32 %v327_v7, %v326_v6 }
 0x1cf   :  { %v329_v10 = vrot.slane %v328_v9, 4 }
 0x1d1   :  { %v330_v12 = vadd.f32 %v329_v10, %v328_v9 }
 0x1d3   :  { %v331_v13 = vrot.slane %v330_v12, 2 }
 0x1d5   :  { %v332_v15 = vadd.f32 %v331_v13, %v330_v12 }
 0x1d7   :  { %v333_v17 = vrot.slane %v332_v15, 1 }
 0x1d9   :  { %v334_v19 = vadd.f32 %v333_v17, %v332_v15 }
 0x1db   :  { %v344_v20 = vadd.f32 %v343_v18, %v334_v19 }
 0x1dd   :  { %346 = vst.msk [vmem:[#allocation3] sm:$0x1] %vm345_vm2, %v344_v20 }
 0x1de   :  { %428 = shalt.err (!%p425_p4)
}
 0x1df   :  { %s429_s19 = scalar_lea.hbm %s582_s7, 16 }
 0x1e0   :  { %p430_p5 = scmp.ne.s32.totalorder %s582_s7, %s429_s19  ;;  %p433_p6 = scmp.lt.u32.totalorder %s429_s19, %s582_s7 }
 0x1e2   :  { %p435_p7 = pnand %p433_p6, %p430_p5 }
 0x1e4   :  { %438 = shalt.err (!%p435_p7)
}
 0x1e5   :  { %356 = dma.vmem_to_hbm [thread:$0]  %s354_s14, 16, %s582_s7, [#allocation4]  }
 0x1e6   :  { %439 = dma.done.wait [#allocation4], 16  }
 0x1e7   :  { %440 = vsyncadd [#allocation4], 4294967280 }
 0x1e8   :  { %360 = vsyncpa [#allocation4], 1 }

</bundles_post_ra>
